<compile_context>
chip_gen: v7x
topology: tpu7x:2x2x1
jax: 0.10.0
libtpu: 0.0.40
codegen_flags: <defaults>
</compile_context>

<pallas_src>
import functools

import jax
import jax.numpy as jnp
from jax.experimental import pallas as pl
from jax.experimental.pallas import tpu as pltpu


# --------------------------------------------------------------------------- #
# Kernel
# --------------------------------------------------------------------------- #
def _ydecoder_kernel(a_ref, w1_ref, b1_ref, w2_ref, b2_ref, w3_ref, b3_ref, o_ref):
    # Cast activations to bf16 in-kernel (input stays unpadded f32 in HBM).
    a = a_ref[...].astype(w1_ref.dtype)
    # Layer 1: Linear(a_dim -> hidden) + ReLU   (bf16 in, f32 accumulate)
    h1 = jnp.dot(a, w1_ref[...], preferred_element_type=jnp.float32)
    h1 = jnp.maximum(h1 + b1_ref[...], 0.0)            # f32 bias + ReLU
    # (Dropout p=0.4 -> identity in eval mode)
    # Layer 2: Linear(hidden -> hidden) + ReLU
    h2 = jnp.dot(h1.astype(w2_ref.dtype), w2_ref[...],
                 preferred_element_type=jnp.float32)
    h2 = jnp.maximum(h2 + b2_ref[...], 0.0)
    # (Dropout p=0.4 -> identity in eval mode)
    # Layer 3: Linear(hidden -> y_dim)
    y = jnp.dot(h2.astype(w3_ref.dtype), w3_ref[...],
                preferred_element_type=jnp.float32) + b3_ref[...]
    o_ref[...] = y.astype(o_ref.dtype)


# --------------------------------------------------------------------------- #
# Wrapper
# --------------------------------------------------------------------------- #
def _round_up(x: int, m: int) -> int:
    return ((x + m - 1) // m) * m


def _choose_tile_b(batch: int, tile_b: int) -> int:
    """Batch tile: multiple of 16 (full bf16 packing), >=2 grid steps when possible."""
    if batch <= 16:
        return batch                       # single full-extent block (always legal)
    tile = max(16, (min(tile_b, batch) // 16) * 16)
    if pl.cdiv(batch, tile) < 2:
        # split so both v7x TensorCores get work on the parallel batch axis
        tile = max(16, _round_up((batch + 1) // 2, 16))
    if tile > batch:
        tile = batch
    return tile


@functools.partial(jax.jit, static_argnames=("tile_b",))
def ydecoder_forward(a, params, tile_b: int = 4096):
    """Fused YDecoder MLP.  `a` is (batch, a_dim); returns (batch, y_dim) in a.dtype."""
    w1, b1, w2, b2, w3, b3 = params
    batch, a_dim = a.shape
    hidden = w1.shape[1]
    y_dim = w3.shape[1]
    out_dtype = a.dtype                     # NOTE: output dtype follows a.dtype
    compute_dtype = jnp.bfloat16

    tile = _choose_tile_b(batch, tile_b)
    nb = pl.cdiv(batch, tile)

    # Weights -> bf16 (tiny, one-time); biases stay f32 (safe on v5e's VPU).
    w1_c = w1.astype(compute_dtype)
    w2_c = w2.astype(compute_dtype)
    w3_c = w3.astype(compute_dtype)
    b1_c = b1.reshape(1, hidden).astype(jnp.float32)
    b2_c = b2.reshape(1, hidden).astype(jnp.float32)
    b3_c = b3.reshape(1, y_dim).astype(jnp.float32)

    in_bytes = jnp.dtype(a.dtype).itemsize
    out_bytes = jnp.dtype(out_dtype).itemsize
    weight_bytes = (a_dim * hidden + hidden * hidden + hidden * y_dim) * 2
    bias_bytes = (2 * hidden + y_dim) * 4

    # VMEM budget: double-buffered activation/output tiles + resident weights +
    # f32/bf16 intermediates; capped at 48 MiB so it also fits v7x's 64 MiB core.
    vmem_est = (
        2 * tile * a_dim * in_bytes            # input tile, double-buffered
        + 2 * tile * y_dim * out_bytes         # output tile, double-buffered
        + 2 * (weight_bytes + bias_bytes)      # resident weights/biases (+slack)
        + tile * a_dim * 2                     # bf16 cast of a
        + 2 * tile * hidden * (4 + 2)          # h1/h2 in f32 + bf16
    )
    vmem_limit = min(max(2 * vmem_est, 4 << 20), 48 << 20)

    flops = 2 * batch * (a_dim * hidden + hidden * hidden + hidden * y_dim)
    bytes_accessed = (
        batch * a_dim * in_bytes + weight_bytes + bias_bytes + batch * y_dim * out_bytes
    )

    row_spec = lambda cols: pl.BlockSpec((tile, cols), lambda i: (i, 0))
    const_spec = lambda rows, cols: pl.BlockSpec((rows, cols), lambda i: (0, 0))

    out = pl.pallas_call(
        _ydecoder_kernel,
        out_shape=jax.ShapeDtypeStruct((batch, y_dim), out_dtype),
        grid=(nb,),
        in_specs=[
            row_spec(a_dim),                 # a tile, streamed over batch (unpadded)
            const_spec(a_dim, hidden),       # w1 (VMEM-resident)
            const_spec(1, hidden),           # b1
            const_spec(hidden, hidden),      # w2
            const_spec(1, hidden),           # b2
            const_spec(hidden, y_dim),       # w3
            const_spec(1, y_dim),            # b3
        ],
        out_specs=row_spec(y_dim),
        compiler_params=pltpu.CompilerParams(
            dimension_semantics=("parallel",),
            vmem_limit_bytes=int(vmem_limit),
        ),
        cost_estimate=pl.CostEstimate(
            flops=flops, transcendentals=0, bytes_accessed=bytes_accessed
        ),
    )(a, w1_c, b1_c, w2_c, b2_c, w3_c, b3_c)

    return out


# --------------------------------------------------------------------------- #
# Params + reference
# --------------------------------------------------------------------------- #
def init_params(key, a_dim, y_dim, hidden_dim=None, dtype=jnp.float32):
    """Deterministic init mimicking torch.nn.Linear's uniform(-1/sqrt(fan_in), +)."""
    hidden = hidden_dim if hidden_dim is not None else 2 * a_dim
    ks = jax.random.split(key, 6)

    def linear(kw, kb, fan_in, fan_out):
        bound = 1.0 / jnp.sqrt(fan_in)
        # stored as (in, out) == torch weight (out, in) transposed
        w = jax.random.uniform(kw, (fan_in, fan_out), dtype, -bound, bound)
        b = jax.random.uniform(kb, (1, fan_out), dtype, -bound, bound)
        return w, b

    w1, b1 = linear(ks[0], ks[1], a_dim, hidden)
    w2, b2 = linear(ks[2], ks[3], hidden, hidden)
    w3, b3 = linear(ks[4], ks[5], hidden, y_dim)
    return (w1, b1, w2, b2, w3, b3)


def ydecoder_reference(a, params, compute_dtype=jnp.float32):
    """Plain-JAX reference (optionally matching the kernel's bf16 matmul inputs)."""
    w1, b1, w2, b2, w3, b3 = params
    cd = compute_dtype
    h1 = jnp.dot(a.astype(cd), w1.astype(cd), preferred_element_type=jnp.float32)
    h1 = jnp.maximum(h1 + b1.astype(jnp.float32), 0.0)
    h2 = jnp.dot(h1.astype(cd), w2.astype(cd), preferred_element_type=jnp.float32)
    h2 = jnp.maximum(h2 + b2.astype(jnp.float32), 0.0)
    y = jnp.dot(h2.astype(cd), w3.astype(cd), preferred_element_type=jnp.float32)
    return y + b3.astype(jnp.float32)


if __name__ == "__main__":
    key = jax.random.PRNGKey(0)
    k_in, k_par, k_in2 = jax.random.split(key, 3)

    a_dim, y_dim = 32, 16  # hidden defaults to 2*a_dim = 64
    params = init_params(k_par, a_dim, y_dim)

    # --- small batch: single full-extent block ---
    batch = 8
    a = jax.random.normal(k_in, (batch, a_dim), jnp.float32)
    out = jax.block_until_ready(ydecoder_forward(a, params))
    assert out.shape == (batch, y_dim), out.shape
    ref_bf16 = ydecoder_reference(a, params, compute_dtype=jnp.bfloat16)
    assert jnp.allclose(out, ref_bf16, atol=2e-3, rtol=2e-3), "mismatch vs bf16 reference"
    ref_f32 = ydecoder_reference(a, params, compute_dtype=jnp.float32)
    assert jnp.allclose(out, ref_f32, atol=5e-2, rtol=5e-2), "mismatch vs f32 reference"

    # --- ragged batch: multi-step grid with a partial last block ---
    batch2 = 40
    a2 = jax.random.normal(k_in2, (batch2, a_dim), jnp.float32)
    out2 = jax.block_until_ready(ydecoder_forward(a2, params))
    assert out2.shape == (batch2, y_dim), out2.shape
    ref2 = ydecoder_reference(a2, params, compute_dtype=jnp.bfloat16)
    assert jnp.allclose(out2, ref2, atol=2e-3, rtol=2e-3), "mismatch on ragged batch"

    print("KERNEL_OK")
</pallas_src>

<mosaic_0001>
module attributes {stable_mosaic.version = 11 : i64} {
  func.func @_ydecoder_kernel(%arg0: i32, %arg1: memref<8x32xf32, #tpu.memory_space<vmem>>, %arg2: memref<32x64xbf16, #tpu.memory_space<vmem>>, %arg3: memref<1x64xf32, #tpu.memory_space<vmem>>, %arg4: memref<64x64xbf16, #tpu.memory_space<vmem>>, %arg5: memref<1x64xf32, #tpu.memory_space<vmem>>, %arg6: memref<64x16xbf16, #tpu.memory_space<vmem>>, %arg7: memref<1x16xf32, #tpu.memory_space<vmem>>, %arg8: memref<8x16xf32, #tpu.memory_space<vmem>>) attributes {dimension_semantics = [#tpu.dimension_semantics<parallel>], iteration_bounds = array<i64: 1>, scalar_prefetch = 0 : i64, scratch_operands = 0 : i64, tpu.core_type = #tpu.core_type<tc>, window_params = [{transform_indices = @transform_0, window_bounds = array<i64: 8, 32>}, {pipeline_mode = #tpu.pipeline_mode<synchronous>, transform_indices = @transform_1, window_bounds = array<i64: 32, 64>}, {pipeline_mode = #tpu.pipeline_mode<synchronous>, transform_indices = @transform_2, window_bounds = array<i64: 1, 64>}, {pipeline_mode = #tpu.pipeline_mode<synchronous>, transform_indices = @transform_3, window_bounds = array<i64: 64, 64>}, {pipeline_mode = #tpu.pipeline_mode<synchronous>, transform_indices = @transform_4, window_bounds = array<i64: 1, 64>}, {pipeline_mode = #tpu.pipeline_mode<synchronous>, transform_indices = @transform_5, window_bounds = array<i64: 64, 16>}, {pipeline_mode = #tpu.pipeline_mode<synchronous>, transform_indices = @transform_6, window_bounds = array<i64: 1, 16>}, {transform_indices = @transform_7, window_bounds = array<i64: 8, 16>}]} {
    %c0 = arith.constant 0 : index
    %c0_0 = arith.constant 0 : index
    %0 = vector.load %arg1[%c0, %c0_0] : memref<8x32xf32, #tpu.memory_space<vmem>>, vector<8x32xf32>
    %1 = arith.truncf %0 : vector<8x32xf32> to vector<8x32xbf16>
    %c0_1 = arith.constant 0 : index
    %c0_2 = arith.constant 0 : index
    %2 = vector.load %arg2[%c0_1, %c0_2] : memref<32x64xbf16, #tpu.memory_space<vmem>>, vector<32x64xbf16>
    %cst = arith.constant dense<0.000000e+00> : vector<8x64xf32>
    %3 = tpu.matmul %1, %2, %cst {dimension_numbers = #tpu.dot_dimension_numbers<[1], [0], [0], [1], [0, 0, 1, 1], [], []>} : vector<8x32xbf16>, vector<32x64xbf16>, vector<8x64xf32> -> vector<8x64xf32>
    %c0_3 = arith.constant 0 : index
    %c0_4 = arith.constant 0 : index
    %4 = vector.load %arg3[%c0_3, %c0_4] : memref<1x64xf32, #tpu.memory_space<vmem>>, vector<1x64xf32>
    %5 = vector.broadcast %4 : vector<1x64xf32> to vector<8x64xf32>
    %6 = arith.addf %3, %5 : vector<8x64xf32>
    %cst_5 = arith.constant 0.000000e+00 : f32
    %7 = vector.broadcast %cst_5 : f32 to vector<8x64xf32>
    %8 = arith.maximumf %6, %7 : vector<8x64xf32>
    %9 = arith.truncf %8 : vector<8x64xf32> to vector<8x64xbf16>
    %c0_6 = arith.constant 0 : index
    %c0_7 = arith.constant 0 : index
    %10 = vector.load %arg4[%c0_6, %c0_7] : memref<64x64xbf16, #tpu.memory_space<vmem>>, vector<64x64xbf16>
    %cst_8 = arith.constant dense<0.000000e+00> : vector<8x64xf32>
    %11 = tpu.matmul %9, %10, %cst_8 {dimension_numbers = #tpu.dot_dimension_numbers<[1], [0], [0], [1], [0, 0, 1, 1], [], []>} : vector<8x64xbf16>, vector<64x64xbf16>, vector<8x64xf32> -> vector<8x64xf32>
    %c0_9 = arith.constant 0 : index
    %c0_10 = arith.constant 0 : index
    %12 = vector.load %arg5[%c0_9, %c0_10] : memref<1x64xf32, #tpu.memory_space<vmem>>, vector<1x64xf32>
    %13 = vector.broadcast %12 : vector<1x64xf32> to vector<8x64xf32>
    %14 = arith.addf %11, %13 : vector<8x64xf32>
    %cst_11 = arith.constant 0.000000e+00 : f32
    %15 = vector.broadcast %cst_11 : f32 to vector<8x64xf32>
    %16 = arith.maximumf %14, %15 : vector<8x64xf32>
    %17 = arith.truncf %16 : vector<8x64xf32> to vector<8x64xbf16>
    %c0_12 = arith.constant 0 : index
    %c0_13 = arith.constant 0 : index
    %18 = vector.load %arg6[%c0_12, %c0_13] : memref<64x16xbf16, #tpu.memory_space<vmem>>, vector<64x16xbf16>
    %cst_14 = arith.constant dense<0.000000e+00> : vector<8x16xf32>
    %19 = tpu.matmul %17, %18, %cst_14 {dimension_numbers = #tpu.dot_dimension_numbers<[1], [0], [0], [1], [0, 0, 1, 1], [], []>} : vector<8x64xbf16>, vector<64x16xbf16>, vector<8x16xf32> -> vector<8x16xf32>
    %c0_15 = arith.constant 0 : index
    %c0_16 = arith.constant 0 : index
    %20 = vector.load %arg7[%c0_15, %c0_16] : memref<1x16xf32, #tpu.memory_space<vmem>>, vector<1x16xf32>
    %21 = vector.broadcast %20 : vector<1x16xf32> to vector<8x16xf32>
    %22 = arith.addf %19, %21 : vector<8x16xf32>
    %c0_17 = arith.constant 0 : index
    %c0_18 = arith.constant 0 : index
    %23 = vector.load %arg8[%c0_17, %c0_18] : memref<8x16xf32, #tpu.memory_space<vmem>>, vector<8x16xf32>
    tpu.vector_store %arg8[%c0_17, %c0_18], %22 {strides = array<i32>} : memref<8x16xf32, #tpu.memory_space<vmem>>, vector<8x16xf32>,
    return
  }
  func.func @transform_0(%arg0: i32) -> (i32, i32) {
    %c0_i32 = arith.constant 0 : i32
    %c0_i32_0 = arith.constant 0 : i32
    return %arg0, %c0_i32 : i32, i32
  }
  func.func @transform_1(%arg0: i32) -> (i32, i32) {
    %c0_i32 = arith.constant 0 : i32
    %c0_i32_0 = arith.constant 0 : i32
    %c0_i32_1 = arith.constant 0 : i32
    return %c0_i32, %c0_i32_0 : i32, i32
  }
  func.func @transform_2(%arg0: i32) -> (i32, i32) {
    %c0_i32 = arith.constant 0 : i32
    %c0_i32_0 = arith.constant 0 : i32
    %c0_i32_1 = arith.constant 0 : i32
    return %c0_i32, %c0_i32_0 : i32, i32
  }
  func.func @transform_3(%arg0: i32) -> (i32, i32) {
    %c0_i32 = arith.constant 0 : i32
    %c0_i32_0 = arith.constant 0 : i32
    %c0_i32_1 = arith.constant 0 : i32
    return %c0_i32, %c0_i32_0 : i32, i32
  }
  func.func @transform_4(%arg0: i32) -> (i32, i32) {
    %c0_i32 = arith.constant 0 : i32
    %c0_i32_0 = arith.constant 0 : i32
    %c0_i32_1 = arith.constant 0 : i32
    return %c0_i32, %c0_i32_0 : i32, i32
  }
  func.func @transform_5(%arg0: i32) -> (i32, i32) {
    %c0_i32 = arith.constant 0 : i32
    %c0_i32_0 = arith.constant 0 : i32
    %c0_i32_1 = arith.constant 0 : i32
    return %c0_i32, %c0_i32_0 : i32, i32
  }
  func.func @transform_6(%arg0: i32) -> (i32, i32) {
    %c0_i32 = arith.constant 0 : i32
    %c0_i32_0 = arith.constant 0 : i32
    %c0_i32_1 = arith.constant 0 : i32
    return %c0_i32, %c0_i32_0 : i32, i32
  }
  func.func @transform_7(%arg0: i32) -> (i32, i32) {
    %c0_i32 = arith.constant 0 : i32
    %c0_i32_0 = arith.constant 0 : i32
    return %arg0, %c0_i32 : i32, i32
  }
}

</mosaic_0001>

<bundles_post_ra>
// kernel: ydecoder_forward.1
= control target key start
LH: loop header
LB: loop body
LE: loop exit
PB: predicated region body
PF: predicated region fallthrough
CT: control target
= control target key end

     0   :  { %v380_v1 = vmov 0.0   ;;  %vm381_vm0 = vmmov 0   ;;  %vm53_vm1 = vcmask 261120   ;;  %s482_s0 = inlined_call_operand.vmem [shape: f32[8,32], index: 0, kind: input, shape index: {}]   ;;  %s483_s1 = inlined_call_operand.vmem [shape: bf16[32,64], index: 1, kind: input, shape index: {}]   ;;  %s484_s2 = inlined_call_operand.vmem [shape: f32[1,64], index: 2, kind: input, shape index: {}]   ;;  %s485_s3 = inlined_call_operand.vmem [shape: bf16[64,64], index: 3, kind: input, shape index: {}]   ;;  %s486_s4 = inlined_call_operand.vmem [shape: f32[1,64], index: 4, kind: input, shape index: {}]   ;;  %s487_s5 = inlined_call_operand.vmem [shape: bf16[64,16], index: 5, kind: input, shape index: {}]   ;;  %s488_s6 = inlined_call_operand.vmem [shape: f32[1,16], index: 6, kind: input, shape index: {}]   ;;  %s489_s7 = inlined_call_operand.hbm [shape: f32[8,16], index: 7, kind: output, shape index: {}]  }
   0x1   :  { %v346_v0 = vld [vmem:[%s483_s1] sm:$0xff]   ;;  %311 = vmatprep.subr.bf16.mxu0 %v380_v1  ;;  %v347_v2 = vld [vmem:[%s483_s1 + $0x8] sm:$0xff]   ;;  %319 = vmatprep.subr.bf16.mxu1 %v380_v1 }
   0x2   :  { %312 = vmatpush3.bf16.msra.mxu0 %v346_v0  ;;  %315 = vmatprep.mubr.msk.bf16.mxu0 %vm381_vm0, %v380_v1  ;;  %v28_v3 = vld [vmem:[%s482_s0] sm:$0xff]  ;;  %v349_v5 = vld [vmem:[%s485_s3 + $0x8] sm:$0xff]  }
   0x3   :  { %313 = vmatprep.subr.bf16.mxu0 %v380_v1  ;;  %v348_v4 = vld [vmem:[%s485_s3] sm:$0xff]   ;;  %327 = vmatprep.mubr.msk.bf16.mxu1 %vm381_vm0, %v380_v1  ;;  %v29_v6 = vpack.c.bf16 %v28_v3, %v28_v3 }
   0x4   :  { %320 = vmatpush3.bf16.msra.mxu1 %v348_v4 }
   0x5   :  { %321 = vmatprep.subr.bf16.mxu1 %v380_v1 }
   0x6   :  { %314 = vmatpush3.bf16.msra.mxu0 %v347_v2 }
   0x7   :  { %331 = vmatprep.subr.bf16.mxu0 %v380_v1 }
   0x8   :  { %12 = vsyncpa [#allocation3], 0  ;;  %322 = vmatpush3.bf16.msra.mxu1 %v349_v5  ;;  %v350_v7 = vld [vmem:[%s485_s3 + $0x10] sm:$0xff]   ;;  %v351_v8 = vld [vmem:[%s485_s3 + $0x18] sm:$0xff]   ;;  %vm138_vm2 = vcmask 523264   ;;  %s382_s25 = smov [#allocation2]  }
   0x9   :  { %316 = vmatmul.mubr.msk.bf16.vlgmr.msra.gmra.mrb[0].mxu0 %vm53_vm1, %v29_v6  ;;  %323 = vmatprep.subr.bf16.mxu1 %v380_v1  ;;  %v352_v9 = vld [vmem:[%s487_s5] sm:$0xff]   ;;  %v353_v10 = vld [vmem:[%s487_s5 + $0x8] sm:$0xff]   ;;  %v354_v19 = vld [vmem:[%s487_s5 + $0x10] sm:$0xff]   ;;  %vm266_vm3 = vcmask 130048  }
   0xa   :  { %339 = vmatprep.mubr.msk.bf16.mxu0 %vm381_vm0, %v380_v1  ;;  %332 = vmatpush3.bf16.msra.mxu0 %v352_v9  ;;  %v282_v11 = vld [vmem:[%s484_s2] ss:$0 sm:$0xff]  ;;  %v355_v20 = vld [vmem:[%s487_s5 + $0x18] sm:$0xff]   ;;  %s274_s5 = sshll.u32 %s382_s25, 4  ;;  %s275_s5 = int_to_ptr.vmem [resolvable:$true] %s274_s5 }
   0xb   :  { %333 = vmatprep.subr.bf16.mxu0 %v380_v1  ;;  %v286_v21 = vld [vmem:[%s486_s4] ss:$0 sm:$0xff]  ;;  %s356_s4 = scalar_lea.vmem %s275_s5, 128  ;;  %p361_p1 = scmp.lt.s32.totalorder %s275_s5, %s275_s5 }
   0xc   :  { %324 = vmatpush3.bf16.msra.mxu1 %v350_v7  ;;  %v292_v29 = vld [vmem:[%s488_s6] ss:$0 sm:$0xff]  ;;  %p357_p0 = scmp.ne.s32.totalorder %s275_s5, %s356_s4  ;;  %p362_p2 = scmp.lt.s32.totalorder %s356_s4, %s356_s4 }
   0xd   :  { %325 = vmatprep.subr.bf16.mxu1 %v380_v1 }
   0xe   :  { %334 = vmatpush3.bf16.msra.mxu0 %v353_v10  ;;  %p363_p3 = por %p362_p2, %p361_p1 }
   0xf   :  { %335 = vmatprep.subr.bf16.mxu0 %v380_v1 }
  0x10   :  { %326 = vmatpush3.bf16.msra.mxu1 %v351_v8  ;;  %p364_p4 = pnand %p363_p3, %p357_p0 }
  0x12   :  { %336 = vmatpush3.bf16.msra.mxu0 %v354_v19 }
  0x13   :  { %337 = vmatprep.subr.bf16.mxu0 %v380_v1 }
  0x16   :  { %338 = vmatpush3.bf16.msra.mxu0 %v355_v20 }
  0xdc   :  { %v91_v12 = vpop.f32.mrb[0].mxu0 }
  0xdd   :  { %v92_v13 = vadd.f32 %v282_v11, %v91_v12  ;;  %v317_v14 = vpop.f32.mrb[1].mxu0 }
  0xde   :  { %v94_v15 = vpop.f32.mrb[2].mxu0 }
  0xdf   :  { %v97_v16 = vmax.f32 %v92_v13, 0.0  ;;  %v318_v17 = vpop.f32.mrb[3].mxu0 }
  0xe1   :  { %v98_v18 = vpack.c.bf16 %v97_v16, %v97_v16 }
  0xe3   :  { %328 = vmatmul.mubr.msk.bf16.vlgmr.msra.gmra.mrb[0].mxu1 %vm138_vm2, %v98_v18 }
 0x1b6   :  { %v176_v22 = vpop.f32.mrb[0].mxu1 }
 0x1b7   :  { %v177_v23 = vadd.f32 %v286_v21, %v176_v22  ;;  %v329_v24 = vpop.f32.mrb[1].mxu1 }
 0x1b8   :  { %v179_v25 = vpop.f32.mrb[2].mxu1 }
 0x1b9   :  { %v182_v26 = vmax.f32 %v177_v23, 0.0  ;;  %v330_v27 = vpop.f32.mrb[3].mxu1 }
 0x1bb   :  { %v183_v28 = vpack.c.bf16 %v182_v26, %v182_v26 }
 0x1bd   :  { %340 = vmatmul.mubr.msk.bf16.vlgmr.msra.gmra.mrb[4].mxu0 %vm138_vm2, %v183_v28 }
 0x290   :  { %v260_v30 = vpop.f32.mrb[4].mxu0 }
 0x291   :  { %v261_v31 = vadd.f32 %v292_v29, %v260_v30  ;;  %v341_v32 = vpop.f32.mrb[5].mxu0 }
 0x292   :  { %v263_v33 = vpop.f32.mrb[6].mxu0 }
 0x293   :  { %v342_v34 = vpop.f32.mrb[7].mxu0  ;;  %267 = vst.msk [vmem:[#allocation2] sm:$0xff] %vm266_vm3, %v261_v31 }
 0x294   :  { %367 = shalt.err (!%p364_p4)
}
 0x295   :  { %s368_s6 = scalar_lea.hbm %s489_s7, 128 }
 0x296   :  { %p369_p5 = scmp.ne.s32.totalorder %s489_s7, %s368_s6  ;;  %p372_p6 = scmp.lt.u32.totalorder %s368_s6, %s489_s7 }
 0x298   :  { %p374_p7 = pnand %p372_p6, %p369_p5 }
 0x29a   :  { %377 = shalt.err (!%p374_p7)
}
 0x29b   :  { %277 = dma.vmem_to_hbm [thread:$0]  %s275_s5, 128, %s489_s7, [#allocation3]  }
 0x29c   :  { %378 = dma.done.wait [#allocation3], 128  }
 0x29d   :  { %379 = vsyncadd [#allocation3], 4294967168 }
 0x29e   :  { %281 = vsyncpa [#allocation3], 1 }

</bundles_post_ra>
